<compile_context>
chip_gen: v5e
topology: v5e:2x2
jax: 0.10.0
libtpu: 0.0.40
codegen_flags: <defaults>
</compile_context>

<pallas_src>
from functools import partial

import jax
import jax.numpy as jnp
from jax.experimental import pallas as pl
from jax.experimental.pallas import tpu as pltpu


# --------------------------------------------------------------------------
# helpers
# --------------------------------------------------------------------------
def _pick_tile(n, candidates=(1024, 512, 256, 128)):
    for t in candidates:
        if n % t == 0:
            return t
    return n


def _const_spec(a):
    """Full-array block with a constant index map (weights / biases)."""
    zeros = (0,) * a.ndim
    return pl.BlockSpec(a.shape, lambda i, _z=zeros: _z)


# --------------------------------------------------------------------------
# 1x1 convolution (pointwise) as a token-tiled Pallas matmul kernel
# --------------------------------------------------------------------------
def _conv1x1_kernel(x_ref, w_ref, b_ref, o_ref):
    # x: (TM, Cin) f32   w: (Cin, Cout) bf16   b: (1, Cout) f32
    x = x_ref[...].astype(jnp.bfloat16)
    o_ref[...] = (
        jnp.dot(x, w_ref[...], preferred_element_type=jnp.float32) + b_ref[...]
    )


def conv1x1(x_nhwc, w_bf16, b_f32):
    N, H, W, Cin = x_nhwc.shape
    Cout = w_bf16.shape[1]
    M = N * H * W
    x_flat = x_nhwc.reshape(M, Cin)
    TM = _pick_tile(M)
    out = pl.pallas_call(
        _conv1x1_kernel,
        out_shape=jax.ShapeDtypeStruct((M, Cout), jnp.float32),
        grid=(M // TM,),
        in_specs=[
            pl.BlockSpec((TM, Cin), lambda i: (i, 0)),
            _const_spec(w_bf16),
            _const_spec(b_f32),
        ],
        out_specs=pl.BlockSpec((TM, Cout), lambda i: (i, 0)),
        compiler_params=pltpu.CompilerParams(dimension_semantics=("parallel",)),
    )(x_flat, w_bf16, b_f32)
    return out.reshape(N, H, W, Cout)


# --------------------------------------------------------------------------
# pixel_shuffle (PyTorch semantics) on NHWC tensors (glue, no compute)
# --------------------------------------------------------------------------
def pixel_shuffle_nhwc(x, r):
    # PyTorch: out[n, c, h*r+i, w*r+j] = in[n, c*r*r + i*r + j, h, w]
    N, H, W, Crr = x.shape
    C = Crr // (r * r)
    x = x.reshape(N, H, W, C, r, r)           # (..., c, i, j)
    x = jnp.transpose(x, (0, 1, 4, 2, 5, 3))  # (N, H, i, W, j, C)
    return x.reshape(N, H * r, W * r, C)


# --------------------------------------------------------------------------
# ViT block kernel 1: LayerNorm1 + Q/K/V projections (token-tiled)
# --------------------------------------------------------------------------
def _ln_qkv_kernel(x_ref, g_ref, b_ref, wq_ref, wk_ref, wv_ref,
                   bq_ref, bk_ref, bv_ref, q_ref, k_ref, v_ref, *, eps):
    x = x_ref[...]                                         # (TM, C) f32
    mu = jnp.mean(x, axis=-1, keepdims=True)
    var = jnp.mean(jnp.square(x - mu), axis=-1, keepdims=True)
    xn = (x - mu) * jax.lax.rsqrt(var + eps) * g_ref[...] + b_ref[...]
    xb = xn.astype(jnp.bfloat16)                           # bf16 MXU operands
    q = jnp.dot(xb, wq_ref[...], preferred_element_type=jnp.float32) + bq_ref[...]
    k = jnp.dot(xb, wk_ref[...], preferred_element_type=jnp.float32) + bk_ref[...]
    v = jnp.dot(xb, wv_ref[...], preferred_element_type=jnp.float32) + bv_ref[...]
    q_ref[...] = q.astype(q_ref.dtype)
    k_ref[...] = k.astype(k_ref.dtype)
    v_ref[...] = v.astype(v_ref.dtype)


def ln_qkv(tokens, p, eps=1e-5):
    M, C = tokens.shape
    TM = _pick_tile(M)
    tile = pl.BlockSpec((TM, C), lambda i: (i, 0))
    args = (tokens, p["ln1_g"], p["ln1_b"], p["wq"], p["wk"], p["wv"],
            p["bq"], p["bk"], p["bv"])
    out_sd = jax.ShapeDtypeStruct((M, C), jnp.bfloat16)
    return pl.pallas_call(
        partial(_ln_qkv_kernel, eps=eps),
        out_shape=(out_sd, out_sd, out_sd),
        grid=(M // TM,),
        in_specs=[tile] + [_const_spec(a) for a in args[1:]],
        out_specs=(tile, tile, tile),
        compiler_params=pltpu.CompilerParams(dimension_semantics=("parallel",)),
    )(*args)


# --------------------------------------------------------------------------
# ViT block kernel 2: head-batched flash attention (online softmax)
# --------------------------------------------------------------------------
def _flash_attn_kernel(q_ref, k_ref, v_ref, o_ref, m_sc, l_sc, acc_sc, *, scale):
    kv = pl.program_id(2)

    @pl.when(kv == 0)
    def _():
        m_sc[...] = jnp.full(m_sc.shape, -jnp.inf, jnp.float32)
        l_sc[...] = jnp.zeros(l_sc.shape, jnp.float32)
        acc_sc[...] = jnp.zeros(acc_sc.shape, jnp.float32)

    q = q_ref[0]                                           # (tq, dh) bf16
    k = k_ref[0]                                           # (tk, dh) bf16
    v = v_ref[0]                                           # (tk, dh) bf16

    s = jax.lax.dot_general(
        q, k, (((1,), (1,)), ((), ())),
        preferred_element_type=jnp.float32,
    ) * scale                                              # (tq, tk) f32

    m_prev = m_sc[...]
    m_new = jnp.maximum(m_prev, jnp.max(s, axis=-1, keepdims=True))
    alpha = jnp.exp(m_prev - m_new)
    p = jnp.exp(s - m_new)
    l_sc[...] = alpha * l_sc[...] + jnp.sum(p, axis=-1, keepdims=True)
    acc_sc[...] = alpha * acc_sc[...] + jnp.dot(
        p.astype(v.dtype), v, preferred_element_type=jnp.float32)
    m_sc[...] = m_new

    @pl.when(kv == pl.num_programs(2) - 1)
    def _():
        inv = pl.reciprocal(l_sc[...], approx=True)        # EUP, nearly free
        o_ref[0] = (acc_sc[...] * inv).astype(o_ref.dtype)


def flash_attention(q, k, v, scale):
    B, L, dh = q.shape
    tq = _pick_tile(L, (256, 128))
    tk = _pick_tile(L, (256, 128))
    nq, nk = L // tq, L // tk
    nbytes = lambda a: a.size * a.dtype.itemsize
    cost = pl.CostEstimate(
        flops=int(4 * B * L * L * dh),
        transcendentals=int(B * L * L),
        bytes_accessed=int(nbytes(q) * nk + (nbytes(k) + nbytes(v)) * nq
                           + nbytes(q)),
    )
    return pl.pallas_call(
        partial(_flash_attn_kernel, scale=scale),
        out_shape=jax.ShapeDtypeStruct((B, L, dh), jnp.bfloat16),
        grid=(B, nq, nk),
        in_specs=[
            pl.BlockSpec((1, tq, dh), lambda b, qi, ki: (b, qi, 0)),
            pl.BlockSpec((1, tk, dh), lambda b, qi, ki: (b, ki, 0)),
            pl.BlockSpec((1, tk, dh), lambda b, qi, ki: (b, ki, 0)),
        ],
        out_specs=pl.BlockSpec((1, tq, dh), lambda b, qi, ki: (b, qi, 0)),
        scratch_shapes=[
            pltpu.VMEM((tq, 1), jnp.float32),   # running max
            pltpu.VMEM((tq, 1), jnp.float32),   # running denom
            pltpu.VMEM((tq, dh), jnp.float32),  # accumulator
        ],
        compiler_params=pltpu.CompilerParams(
            dimension_semantics=("parallel", "parallel", "arbitrary")),
        cost_estimate=cost,
    )(q, k, v)


# --------------------------------------------------------------------------
# ViT block kernel 3: attn-proj + residual + LN2 + MLP + residual
# --------------------------------------------------------------------------
def _proj_mlp_kernel(x_ref, a_ref, wp_ref, bp_ref, g2_ref, bt2_ref,
                     w1_ref, b1_ref, w2_ref, b2_ref, o_ref, *, eps):
    x = x_ref[...]                                         # (TM, C) f32 residual
    a = a_ref[...]                                         # (TM, C) bf16 attn
    y = x + jnp.dot(a, wp_ref[...], preferred_element_type=jnp.float32) + bp_ref[...]

    mu = jnp.mean(y, axis=-1, keepdims=True)
    var = jnp.mean(jnp.square(y - mu), axis=-1, keepdims=True)
    yn = (y - mu) * jax.lax.rsqrt(var + eps) * g2_ref[...] + bt2_ref[...]

    h = jnp.dot(yn.astype(jnp.bfloat16), w1_ref[...],
                preferred_element_type=jnp.float32) + b1_ref[...]
    # TODO(synk): PyTorch nn.GELU default is exact erf-GELU; tanh approximation
    #             used here (small systematic difference, TPU-friendly).
    h = jax.nn.gelu(h, approximate=True)
    o = y + jnp.dot(h.astype(jnp.bfloat16), w2_ref[...],
                    preferred_element_type=jnp.float32) + b2_ref[...]
    o_ref[...] = o


def proj_mlp(tokens, attn, p, eps=1e-5):
    M, C = tokens.shape
    TM = _pick_tile(M)
    tile = pl.BlockSpec((TM, C), lambda i: (i, 0))
    args = (tokens, attn, p["wp"], p["bp"], p["ln2_g"], p["ln2_b"],
            p["w1"], p["b1"], p["w2"], p["b2"])
    return pl.pallas_call(
        partial(_proj_mlp_kernel, eps=eps),
        out_shape=jax.ShapeDtypeStruct((M, C), jnp.float32),
        grid=(M // TM,),
        in_specs=[tile, tile] + [_const_spec(a) for a in args[2:]],
        out_specs=tile,
        compiler_params=pltpu.CompilerParams(dimension_semantics=("parallel",)),
    )(*args)


# --------------------------------------------------------------------------
# One pre-norm ViT block = three pallas_calls + head split/merge glue
# --------------------------------------------------------------------------
def vit_block_forward(tokens, p, N, L, C, num_heads):
    dh = C // num_heads
    q, k, v = ln_qkv(tokens, p)                            # each (N*L, C) bf16

    def split_heads(t):  # (N*L, C) -> (N*num_heads, L, dh), pure layout glue
        return (t.reshape(N, L, num_heads, dh)
                 .transpose(0, 2, 1, 3)
                 .reshape(N * num_heads, L, dh))

    attn = flash_attention(split_heads(q), split_heads(k), split_heads(v),
                           scale=dh ** -0.5)               # (N*nh, L, dh) bf16
    attn = (attn.reshape(N, num_heads, L, dh)
                .transpose(0, 2, 1, 3)
                .reshape(N * L, C))
    return proj_mlp(tokens, attn, p)                       # (N*L, C) f32


# --------------------------------------------------------------------------
# TransformModule (JAX / Pallas)
# --------------------------------------------------------------------------
class TransformModulePallas:
    def __init__(self, in_ch, out_ch, depth, num_heads, kernel_size=7,
                 mlp_ratio=4, upscale_factor=4, key=None):
        self.in_ch = in_ch
        self.out_ch = out_ch
        self.depth = depth
        self.num_heads = num_heads
        self.kernel_size = kernel_size  # TODO(synk): unused (see header note)
        self.r = upscale_factor

        key = key if key is not None else jax.random.PRNGKey(0)
        C = out_ch
        hidden = C * mlp_ratio
        Cup = out_ch * upscale_factor ** 2

        def w_init(k, shape, std=0.02):
            # weights stored bf16 (MXU operands); biases / LN params stay f32
            return (std * jax.random.normal(k, shape, dtype=jnp.float32)
                    ).astype(jnp.bfloat16)

        k_up, key = jax.random.split(key)
        # 1x1 conv weights stored as (Cin, Cout) for the token matmul kernel
        self.w_up = w_init(k_up, (in_ch, Cup))
        self.b_up = jnp.zeros((1, Cup), jnp.float32)

        self.blocks = []
        for _ in range(depth):
            ks = jax.random.split(key, 7)
            key = ks[0]
            self.blocks.append(dict(
                ln1_g=jnp.ones((1, C), jnp.float32),
                ln1_b=jnp.zeros((1, C), jnp.float32),
                wq=w_init(ks[1], (C, C)), bq=jnp.zeros((1, C), jnp.float32),
                wk=w_init(ks[2], (C, C)), bk=jnp.zeros((1, C), jnp.float32),
                wv=w_init(ks[3], (C, C)), bv=jnp.zeros((1, C), jnp.float32),
                wp=w_init(ks[4], (C, C)), bp=jnp.zeros((1, C), jnp.float32),
                ln2_g=jnp.ones((1, C), jnp.float32),
                ln2_b=jnp.zeros((1, C), jnp.float32),
                w1=w_init(ks[5], (C, hidden)),
                b1=jnp.zeros((1, hidden), jnp.float32),
                w2=w_init(ks[6], (hidden, C)),
                b2=jnp.zeros((1, C), jnp.float32),
            ))

    def __call__(self, x_nchw, quality):
        # TODO(synk): `quality` conditioning of ViTBlock is unspecified in the
        #             provided source; accepted and passed through unused.
        x = jnp.transpose(x_nchw, (0, 2, 3, 1)).astype(jnp.float32)  # NHWC
        x = conv1x1(x, self.w_up, self.b_up)        # upsample_layer (1x1 conv)
        x = pixel_shuffle_nhwc(x, self.r)           # F.pixel_shuffle
        N, H, W, C = x.shape
        L = H * W
        tokens = x.reshape(N * L, C)
        for p in self.blocks:                       # transform_layer (ViTBlock)
            tokens = vit_block_forward(tokens, p, N, L, C, self.num_heads)
        x = tokens.reshape(N, H, W, C)
        return jnp.transpose(x, (0, 3, 1, 2))       # back to NCHW


# --------------------------------------------------------------------------
# Pure-JAX f32 reference (same math, full softmax) for a loose sanity check
# --------------------------------------------------------------------------
def _reference_forward(module, x_nchw):
    f32 = jnp.float32
    x = jnp.transpose(x_nchw, (0, 2, 3, 1)).astype(f32)
    N, H, W, Cin = x.shape
    x = x.reshape(N * H * W, Cin) @ module.w_up.astype(f32) + module.b_up
    x = pixel_shuffle_nhwc(x.reshape(N, H, W, -1), module.r)
    N, H, W, C = x.shape
    t = x.reshape(N, H * W, C)
    nh = module.num_heads
    dh = C // nh
    scale = dh ** -0.5

    def ln(v, g, b):
        mu = jnp.mean(v, -1, keepdims=True)
        var = jnp.mean((v - mu) ** 2, -1, keepdims=True)
        return (v - mu) * jax.lax.rsqrt(var + 1e-5) * g + b

    def split(z):
        return z.reshape(N, -1, nh, dh).transpose(0, 2, 1, 3)

    for p in module.blocks:
        xn = ln(t, p["ln1_g"], p["ln1_b"])
        q = split(xn @ p["wq"].astype(f32) + p["bq"])
        k = split(xn @ p["wk"].astype(f32) + p["bk"])
        v = split(xn @ p["wv"].astype(f32) + p["bv"])
        s = jnp.einsum("bhqd,bhkd->bhqk", q, k) * scale
        a = jax.nn.softmax(s, axis=-1)
        o = jnp.einsum("bhqk,bhkd->bhqd", a, v)
        o = o.transpose(0, 2, 1, 3).reshape(N, -1, C)
        t = t + o @ p["wp"].astype(f32) + p["bp"]
        yn = ln(t, p["ln2_g"], p["ln2_b"])
        h = jax.nn.gelu(yn @ p["w1"].astype(f32) + p["b1"], approximate=True)
        t = t + h @ p["w2"].astype(f32) + p["b2"]
    return jnp.transpose(t.reshape(N, H, W, C), (0, 3, 1, 2))


if __name__ == "__main__":
    key = jax.random.PRNGKey(0)
    k_x, k_w = jax.random.split(key)

    in_ch, out_ch, depth, num_heads, upscale = 16, 8, 2, 2, 4
    N, H, W = 2, 4, 4

    module = TransformModulePallas(
        in_ch=in_ch, out_ch=out_ch, depth=depth, num_heads=num_heads,
        kernel_size=7, mlp_ratio=4, upscale_factor=upscale, key=k_w,
    )

    x = jax.random.normal(k_x, (N, in_ch, H, W), dtype=jnp.float32)
    quality = 1.0  # passed through (see TODO in header)

    y = jax.block_until_ready(module(x, quality))

    assert y.shape == (N, out_ch, H * upscale, W * upscale), y.shape
    assert y.dtype == jnp.float32

    # loose numerical check vs pure-JAX f32 reference (bf16 MXU operands,
    # approx reciprocal and online softmax introduce only small differences)
    y_ref = jax.block_until_ready(_reference_forward(module, x))
    max_diff = float(jnp.max(jnp.abs(y - y_ref)))
    assert max_diff < 5e-2, f"max |diff| vs reference = {max_diff}"

    print("KERNEL_OK")
</pallas_src>

<mosaic_0001>
module attributes {stable_mosaic.version = 11 : i64} {
  func.func @_conv1x1_kernel(%arg0: i32, %arg1: memref<32x16xf32, #tpu.memory_space<vmem>>, %arg2: memref<16x128xbf16, #tpu.memory_space<vmem>>, %arg3: memref<1x128xf32, #tpu.memory_space<vmem>>, %arg4: memref<32x128xf32, #tpu.memory_space<vmem>>) attributes {dimension_semantics = [#tpu.dimension_semantics<parallel>], iteration_bounds = array<i64: 1>, scalar_prefetch = 0 : i64, scratch_operands = 0 : i64, tpu.core_type = #tpu.core_type<tc>, window_params = [{transform_indices = @transform_0, window_bounds = array<i64: 32, 16>}, {pipeline_mode = #tpu.pipeline_mode<synchronous>, transform_indices = @transform_1, window_bounds = array<i64: 16, 128>}, {pipeline_mode = #tpu.pipeline_mode<synchronous>, transform_indices = @transform_2, window_bounds = array<i64: 1, 128>}, {transform_indices = @transform_3, window_bounds = array<i64: 32, 128>}]} {
    %c0 = arith.constant 0 : index
    %c0_0 = arith.constant 0 : index
    %0 = vector.load %arg1[%c0, %c0_0] : memref<32x16xf32, #tpu.memory_space<vmem>>, vector<32x16xf32>
    %1 = arith.truncf %0 : vector<32x16xf32> to vector<32x16xbf16>
    %c0_1 = arith.constant 0 : index
    %c0_2 = arith.constant 0 : index
    %2 = vector.load %arg2[%c0_1, %c0_2] : memref<16x128xbf16, #tpu.memory_space<vmem>>, vector<16x128xbf16>
    %cst = arith.constant dense<0.000000e+00> : vector<32x128xf32>
    %3 = tpu.matmul %1, %2, %cst {dimension_numbers = #tpu.dot_dimension_numbers<[1], [0], [0], [1], [0, 0, 1, 1], [], []>} : vector<32x16xbf16>, vector<16x128xbf16>, vector<32x128xf32> -> vector<32x128xf32>
    %c0_3 = arith.constant 0 : index
    %c0_4 = arith.constant 0 : index
    %4 = vector.load %arg3[%c0_3, %c0_4] : memref<1x128xf32, #tpu.memory_space<vmem>>, vector<1x128xf32>
    %5 = vector.broadcast %4 : vector<1x128xf32> to vector<32x128xf32>
    %6 = arith.addf %3, %5 : vector<32x128xf32>
    %c0_5 = arith.constant 0 : index
    %c0_6 = arith.constant 0 : index
    %7 = vector.load %arg4[%c0_5, %c0_6] : memref<32x128xf32, #tpu.memory_space<vmem>>, vector<32x128xf32>
    tpu.vector_store %arg4[%c0_5, %c0_6], %6 {strides = array<i32>} : memref<32x128xf32, #tpu.memory_space<vmem>>, vector<32x128xf32>,
    return
  }
  func.func @transform_0(%arg0: i32) -> (i32, i32) {
    %c0_i32 = arith.constant 0 : i32
    %c0_i32_0 = arith.constant 0 : i32
    return %arg0, %c0_i32 : i32, i32
  }
  func.func @transform_1(%arg0: i32) -> (i32, i32) {
    %c0_i32 = arith.constant 0 : i32
    %c0_i32_0 = arith.constant 0 : i32
    %c0_i32_1 = arith.constant 0 : i32
    return %c0_i32, %c0_i32_0 : i32, i32
  }
  func.func @transform_2(%arg0: i32) -> (i32, i32) {
    %c0_i32 = arith.constant 0 : i32
    %c0_i32_0 = arith.constant 0 : i32
    %c0_i32_1 = arith.constant 0 : i32
    return %c0_i32, %c0_i32_0 : i32, i32
  }
  func.func @transform_3(%arg0: i32) -> (i32, i32) {
    %c0_i32 = arith.constant 0 : i32
    %c0_i32_0 = arith.constant 0 : i32
    return %arg0, %c0_i32 : i32, i32
  }
}

</mosaic_0001>

<bundles_post_ra>
// kernel: tpu_custom_call.1
= control target key start
LH: loop header
LB: loop body
LE: loop exit
PB: predicated region body
PF: predicated region fallthrough
CT: control target
= control target key end

     0   :  { %vm34_vm0 = vcmask 130048   ;;  %s164_s0 = inlined_call_operand.vmem [shape: f32[32,16], index: 0, kind: input, shape index: {}]   ;;  %s165_s1 = inlined_call_operand.vmem [shape: bf16[16,128], index: 1, kind: input, shape index: {}]   ;;  %s166_s2 = inlined_call_operand.vmem [shape: f32[1,128], index: 2, kind: input, shape index: {}]   ;;  %s167_s3 = inlined_call_operand.hbm [shape: f32[32,128], index: 3, kind: output, shape index: {}]  }
   0x1   :  { %v88_v0 = vld [vmem:[%s165_s1] sm:$0xff]  ;;  %v17_v2 = vld [vmem:[%s164_s0 + $0x8] sm:$0xff]  ;;  %v18_v4 = vld [vmem:[%s164_s0 + $0x10] sm:$0xff] }
   0x2   :  { %v16_v1 = vld [vmem:[%s164_s0] sm:$0xff]  ;;  %v19_v5 = vld [vmem:[%s164_s0 + $0x18] sm:$0xff]  ;;  %48 = vmatpush.bf16.msra.mxu0 %v88_v0  ;;  %89 = vmatpush.bf16.msra.mxu1 %v88_v0 }
   0x3   :  { %v20_v3 = vpack.c.bf16 %v17_v2, %v16_v1  ;;  %v21_v6 = vpack.c.bf16 %v19_v5, %v18_v4 }
   0x4   :  { %8 = vsyncpa [#allocation3], 0  ;;  %v93_v7 = vld [vmem:[%s166_s2] ss:$0 sm:$0xff]  ;;  %s120_s23 = smov [#allocation2]   ;;  %s70_s26 = sshll.u32 %s167_s3, 4  ;;  %s71_s26 = int_to_ptr.hbm [resolvable:$true] %s70_s26 }
   0x5   :  { %86 = vmatmul.msk.bf16.vlgmr.msra.gmra.mxu0 %vm34_vm0, %v20_v3  ;;  %87 = vmatmul.msk.bf16.vlgmr.msra.gmra.mxu1 %vm34_vm0, %v21_v6  ;;  %s68_s24 = sshll.u32 %s120_s23, 4  ;;  %s121_s2 = smov 128   ;;  %s69_s24 = int_to_ptr.vmem [resolvable:$true] %s68_s24 }
   0x6   :  { %s122_s27 = smov 8  }
  0x82   :  { %v50_v8 = vpop.f32.mrf.mxu0  ;;  %v55_v9 = vpop.f32.mrf.mxu1 }
  0x83   :  { %v51_v10 = vadd.f32 %v93_v7, %v50_v8  ;;  %v56_v11 = vadd.f32 %v93_v7, %v55_v9 }
  0x85   :  { %60 = vst [vmem:[#allocation2] sm:$0xff] %v51_v10 }
  0x86   :  { %62 = vst [vmem:[#allocation2 + $0x10] sm:$0xff] %v56_v11 }
  0x8a   :  { %v52_v12 = vpop.f32.mrf.mxu0  ;;  %v57_v13 = vpop.f32.mrf.mxu1 }
  0x8b   :  { %v53_v14 = vadd.f32 %v93_v7, %v52_v12  ;;  %v58_v15 = vadd.f32 %v93_v7, %v57_v13 }
  0x8d   :  { %61 = vst [vmem:[#allocation2 + $0x8] sm:$0xff] %v53_v14 }
  0x8e   :  { %63 = vst [vmem:[#allocation2 + $0x18] sm:$0xff] %v58_v15 }
  0x8f   :  { %76 = dma.vmem_to_hbm [thread:$0]  %s69_s24, 512, %s71_s26, [#allocation3], %s121_s2, %s121_s2, %s122_s27  }
  0x90   :  { %118 = dma.done.wait [#allocation3], 512  }
  0x91   :  { %119 = vsyncadd [#allocation3], 4294966784 }
  0x92   :  { %81 = vsyncpa [#allocation3], 1 }

</bundles_post_ra>
